<compile_context>
chip_gen: v5e
topology: v5e:2x2
jax: 0.10.0
libtpu: 0.0.40
codegen_flags: <defaults>
</compile_context>

<pallas_src>
import jax
import jax.numpy as jnp
from jax.experimental import pallas as pl
from jax.experimental.pallas import tpu as pltpu

EPS = 1e-10


def _l2norm_kernel(w_ref, x_ref, o_ref):
    # x_ref / o_ref: (C, T) — channels on sublanes, spatial positions on lanes.
    # w_ref: (C, 1) per-channel scale (column broadcast).
    x = x_ref[...].astype(jnp.float32)
    # Channel-wise L2 norm: sqrt(sum_c x^2) + eps  (matches the PyTorch module).
    norm = jnp.sqrt(jnp.sum(x * x, axis=0, keepdims=True)) + EPS   # (1, T)
    out = (x / norm) * w_ref[...].astype(jnp.float32)              # (C,T)/(1,T)*(C,1)
    o_ref[...] = out.astype(o_ref.dtype)


def _pick_tile_hw(hw: int, c: int, itemsize: int, budget_bytes: int = 2 << 20) -> int:
    """Largest lane tile (multiple of 128 dividing hw) within a per-block VMEM budget.

    ~2 MiB per block keeps (double-buffered input + output) well under v5e's
    16 MiB scoped-VMEM default and v7x's 64 MiB physical VMEM even for C=512.
    """
    if hw % 128 != 0:
        # Full-extent block is always legal regardless of lane alignment.
        return hw
    max_elems = max(128, budget_bytes // max(1, c * itemsize))
    best = 128
    for t in range(128, min(hw, max_elems) + 1, 128):
        if hw % t == 0:
            best = t
    return best


def l2norm(x_nchw: jax.Array, weight: jax.Array) -> jax.Array:
    """L2Norm forward. x_nchw: (N, C, H, W); weight: (C,)."""
    N, C, H, W = x_nchw.shape
    HW = H * W
    # Free, contiguous reshape — no transpose, no padding.
    x3 = x_nchw.reshape(N, C, HW)
    w2d = weight.reshape(C, 1)

    tile_hw = _pick_tile_hw(HW, C, jnp.dtype(x_nchw.dtype).itemsize)
    grid = (N, HW // tile_hw)

    out3 = pl.pallas_call(
        _l2norm_kernel,
        out_shape=jax.ShapeDtypeStruct((N, C, HW), x_nchw.dtype),
        grid_spec=pltpu.PrefetchScalarGridSpec(
            num_scalar_prefetch=0,
            grid=grid,
            in_specs=[
                # Per-channel scale, broadcast to every grid point.
                pl.BlockSpec((C, 1), lambda n, j: (0, 0)),
                # One batch element, all channels, a lane tile of spatial positions.
                pl.BlockSpec((None, C, tile_hw), lambda n, j: (n, 0, j)),
            ],
            out_specs=pl.BlockSpec((None, C, tile_hw), lambda n, j: (n, 0, j)),
        ),
        compiler_params=pltpu.CompilerParams(
            # Both grid axes are independent -> shard across the 2 TCs on v7x;
            # neutral on v5e/v6e.
            dimension_semantics=("parallel", "parallel"),
        ),
    )(w2d, x3)

    return out3.reshape(N, C, H, W)


def l2norm_ref(x_nchw, weight):
    norm = jnp.sqrt(jnp.sum(x_nchw * x_nchw, axis=1, keepdims=True)) + EPS
    return weight[None, :, None, None] * (x_nchw / norm)


if __name__ == "__main__":
    key = jax.random.PRNGKey(0)
    N, C, H, W = 2, 4, 16, 16
    scale = 20.0  # typical SSD L2Norm gamma; init.constant_(self.weight, self.gamma)

    x = jax.random.normal(key, (N, C, H, W), dtype=jnp.float32)
    weight = jnp.full((C,), scale, dtype=jnp.float32)

    out = l2norm(x, weight)
    out = jax.block_until_ready(out)

    ref = l2norm_ref(x, weight)
    assert out.shape == (N, C, H, W)
    assert jnp.allclose(out, ref, atol=1e-5, rtol=1e-5)

    print("KERNEL_OK")
</pallas_src>

<mosaic_0001>
module attributes {stable_mosaic.version = 11 : i64} {
  func.func @_l2norm_kernel(%arg0: i32, %arg1: i32, %arg2: memref<4x1xf32, #tpu.memory_space<vmem>>, %arg3: memref<1x4x256xf32, #tpu.memory_space<vmem>>, %arg4: memref<1x4x256xf32, #tpu.memory_space<vmem>>) attributes {dimension_semantics = [#tpu.dimension_semantics<parallel>, #tpu.dimension_semantics<parallel>], iteration_bounds = array<i64: 2, 1>, scalar_prefetch = 0 : i64, scratch_operands = 0 : i64, tpu.core_type = #tpu.core_type<tc>, window_params = [{pipeline_mode = #tpu.pipeline_mode<synchronous>, transform_indices = @transform_0, window_bounds = array<i64: 4, 1>}, {transform_indices = @transform_1, window_bounds = array<i64: 1, 4, 256>}, {transform_indices = @transform_2, window_bounds = array<i64: 1, 4, 256>}]} {
    %c0 = arith.constant 0 : index
    %c0_0 = arith.constant 0 : index
    %c0_1 = arith.constant 0 : index
    %0 = vector.load %arg3[%c0, %c0_0, %c0_1] : memref<1x4x256xf32, #tpu.memory_space<vmem>>, vector<1x4x256xf32>
    %1 = vector.shape_cast %0 : vector<1x4x256xf32> to vector<4x256xf32>
    %2 = arith.mulf %1, %1 : vector<4x256xf32>
    %cst = arith.constant dense<0.000000e+00> : vector<256xf32>
    %3 = vector.multi_reduction <add>, %2, %cst [0] : vector<4x256xf32> to vector<256xf32>
    %4 = vector.shape_cast %3 : vector<256xf32> to vector<1x256xf32>
    %5 = math.sqrt %4 : vector<1x256xf32>
    %cst_2 = arith.constant 1.000000e-10 : f32
    %6 = vector.broadcast %cst_2 : f32 to vector<1x256xf32>
    %7 = arith.addf %5, %6 : vector<1x256xf32>
    %8 = vector.broadcast %7 : vector<1x256xf32> to vector<4x256xf32>
    %9 = arith.divf %1, %8 : vector<4x256xf32>
    %c0_3 = arith.constant 0 : index
    %c0_4 = arith.constant 0 : index
    %10 = vector.load %arg2[%c0_3, %c0_4] : memref<4x1xf32, #tpu.memory_space<vmem>>, vector<4x1xf32>
    %11 = vector.broadcast %10 : vector<4x1xf32> to vector<4x256xf32>
    %12 = arith.mulf %9, %11 : vector<4x256xf32>
    %c0_5 = arith.constant 0 : index
    %c0_6 = arith.constant 0 : index
    %c0_7 = arith.constant 0 : index
    %13 = vector.load %arg4[%c0_5, %c0_6, %c0_7] : memref<1x4x256xf32, #tpu.memory_space<vmem>>, vector<1x4x256xf32>
    %14 = vector.shape_cast %13 : vector<1x4x256xf32> to vector<4x256xf32>
    %15 = vector.shape_cast %12 : vector<4x256xf32> to vector<1x4x256xf32>
    tpu.vector_store %arg4[%c0_5, %c0_6, %c0_7], %15 {strides = array<i32>} : memref<1x4x256xf32, #tpu.memory_space<vmem>>, vector<1x4x256xf32>,
    return
  }
  func.func @transform_0(%arg0: i32, %arg1: i32) -> (i32, i32) {
    %c0_i32 = arith.constant 0 : i32
    %c0_i32_0 = arith.constant 0 : i32
    %c0_i32_1 = arith.constant 0 : i32
    return %c0_i32, %c0_i32_0 : i32, i32
  }
  func.func @transform_1(%arg0: i32, %arg1: i32) -> (i32, i32, i32) {
    %c0_i32 = arith.constant 0 : i32
    %c0_i32_0 = arith.constant 0 : i32
    return %arg0, %c0_i32, %arg1 : i32, i32, i32
  }
  func.func @transform_2(%arg0: i32, %arg1: i32) -> (i32, i32, i32) {
    %c0_i32 = arith.constant 0 : i32
    %c0_i32_0 = arith.constant 0 : i32
    return %arg0, %c0_i32, %arg1 : i32, i32, i32
  }
}

</mosaic_0001>

<bundles_post_ra>
// kernel: tpu_custom_call.1
= control target key start
LH: loop header
LB: loop body
LE: loop exit
PB: predicated region body
PF: predicated region fallthrough
CT: control target
= control target key end

     0   :  { %7 = vsyncpa [#allocation3], 0  ;;  %s720_s0 = inlined_call_operand.vmem [shape: f32[4,1], index: 0, kind: input, shape index: {}]   ;;  %s721_s1 = inlined_call_operand.hbm [shape: f32[2,4,256], index: 1, kind: input, shape index: {}]   ;;  %s722_s2 = inlined_call_operand.hbm [shape: f32[2,4,256], index: 2, kind: output, shape index: {}]  }
   0x1   :  { %9 = vsyncpa [#allocation3 + $0x1], 0 }
   0x2   :  { %10 = vsyncpa [#allocation4], 0 }
   0x3   :  { %12 = vsyncpa [#allocation4 + $0x1], 0  ;;  %s585_s9 = smov 0   ;;  %s587_s10 = smov 0  }
   0x4   :  { %s589_s11 = smov 0   ;;  %s591_s12 = smov 0  }
   0x5   :  { %s593_s13 = smov 0   ;;  %s595_s14 = smov 0  }
   0x6 LB: > { %s366_s15 = sadd.s32 4294967295, %s566_s14   ;;  %s367_s16 = sadd.s32 4294967294, %s566_s14   ;;  %s566_s14 = sphi %s595_s14, %s18_s14   ;;  %s562_s13 = sphi %s593_s13, %s731_s13   ;;  %s558_s12 = sphi %s591_s12, %s730_s12   ;;  %s554_s11 = sphi %s589_s11, %s729_s11   ;;  %s550_s10 = sphi %s587_s10, %s728_s10   ;;  %s546_s9 = sphi %s585_s9, %s727_s9  }
   0x7   : > { %s30_s17 = sadd.s32 1, %s562_s13  ;;  %s60_s18 = sadd.s32 1, %s554_s11 }
   0x8   : > { %p32_p0 = scmp.ge.s32.totalorder %s30_s17, 2  ;;  %p67_p1 = scmp.ne.s32.totalorder %s554_s11, %s550_s10 }
   0x9   : > { %p68_p2 = scmp.eq.s32.totalorder %s566_s14, 0  ;;  %p73_p3 = scmp.ne.s32.totalorder %s550_s10, %s546_s9 }
   0xa   : > { %s733_s17 = smov (%p32_p0, %s30_s17), 0  ;;  %p74_p5 = scmp.eq.s32.totalorder %s366_s15, 0 }
   0xb   : > { %p626_p4 = por %p68_p2, %p67_p1  ;;  %s55_s20 = ssub.s32 %s562_s13, %s733_s17 }
   0xc   : > { %p99_p6 = scmp.eq.s32.totalorder %s366_s15, 1  ;;  %p58_p7 = scmp.eq.s32.totalorder %s55_s20, 0 }
   0xd   : > { %p632_p8 = por %p74_p5, %p73_p3  ;;  %p105_p10 = scmp.eq.s32.totalorder %s367_s16, 1 }
   0xe   : > { %p636_p9 = por %p99_p6, %p67_p1  ;;  %p369_p12 = scmp.ge.s32.totalorder %s566_s14, 2 }
   0xf   : > { %s641_s23 = scalar_select %p58_p7, %s554_s11, %s60_s18  }
  0x10   : > { %p643_p11 = por %p105_p10, %p73_p3  ;;  %p395_p13 = scmp.lt.s32.totalorder %s566_s14, 2 }
  0x11   : > { %s128_s25 = sand.u32 1, %s554_s11   ;;  %s381_s27 = sshll.u32 %s562_s13, 3 }
  0x12   : > { %s370_s26 = sshll.u32 %s128_s25, 3  ;;  %s139_s30 = scalar_lea.hbm %s721_s1, %s381_s27 }
  0x13   : > { %s132_s3 = scalar_lea.vmem [#allocation2], %s370_s26  ;;  %s141_s5 = sshll.u32 %s139_s30, 4  ;;  %s142_s5 = int_to_ptr.hbm [resolvable:$true] %s141_s5 }
  0x14   : > { %s143_s4 = sshll.u32 %s132_s3, 4  ;;  %p388_p0 = pnand %p395_p13, %p626_p4  ;;  %s144_s4 = int_to_ptr.vmem [resolvable:$true] %s143_s4 }
  0x15   : > { %p373_p1 = scmp.ge.s32.totalorder %s566_s14, 1  ;;  %p148_p2 = scmp.lt.s32.totalorder %s566_s14, 3 }
  0x16   : > { %s129_s6 = scalar_lea.sflag [#allocation3], %s128_s25 }
  0x17   : > { %390 = dma.hbm_to_vmem [thread:$0]  (!%p388_p0), %s142_s5, 128, %s144_s4, %s129_s6  }
  0x18   : > { %p149_p3 = pnand %p373_p1, %p148_p2 }
  0x19   : > { %s659_s7 = sand.u32 (!%p149_p3), 1, %s550_s10  }
  0x1a   : > { %152 = sbr.rel (%p149_p3) target bundleno = 156 (0x9c), region = 28  ;;  %s374_s8 = sshll.u32 (!%p149_p3), %s659_s7, 3 }
  0x1b   : > { %s155_s15 = scalar_lea.sflag (!%p149_p3), [#allocation3], %s659_s7  ;;  %s158_s16 = scalar_lea.vmem (!%p149_p3), [#allocation2], %s374_s8 }
  0x1f   : > { %537 = dma.done.wait (%p632_p8), %s155_s15, 128  }
  0x20   : > { %539 = vsyncadd (%p632_p8), %s155_s15, 4294967168  ;;  %v568_v0 = vmov 0   ;;  %v251_v1 = vld [vmem:[%s720_s0] sm:$0xf]  ;;  %v672_v2 = vld [vmem:[%s158_s16] sm:$0xff]  ;;  %vm190_vm0 = vcmask 1043456  }
  0x21   : > { %447 = vset.pattern.permute.xlu0 %v568_v0  ;;  %v183_v3 = vmul.f32 %v672_v2, %v672_v2  ;;  %v569_v52 = vmov 839922192   ;;  %s382_s20 = sshll.u32 %s558_s12, 3  ;;  %s179_s27 = scalar_lea.vmem [#allocation5], %s374_s8 }
  0x22   : > { %254 = vperm.xlu0 %447, %v251_v1   ;;  %v257_v53 = vunpack.c.l.s4 %v569_v52  ;;  %s277_s26 = scalar_lea.hbm %s722_s2, %s382_s20  ;;  %s279_s28 = sshll.u32 %s179_s27, 4  ;;  %s280_s28 = int_to_ptr.vmem [resolvable:$true] %s279_s28 }
  0x23   : > { %185 = vst [vmem:[#allocation1] ss:$2 sm:$0xff] %v183_v3  ;;  %s281_s29 = sshll.u32 %s277_s26, 4  ;;  %s264_s12 = scalar_lea.sflag [#allocation4], %s659_s7  ;;  %s282_s29 = int_to_ptr.hbm [resolvable:$true] %s281_s29 }
  0x24   : > { %v258_v56 = vunpack.c.0.s8 %v257_v53  ;;  %s498_s30 = sshra.s32 %s282_s29, 4  ;;  %s504_s6 = scalar_lea.hbm %s722_s2, 16  ;;  %s499_s30 = int_to_ptr.hbm [resolvable:$true] %s498_s30 }
  0x25   : > { %s500_s3 = scalar_lea.hbm %s499_s30, 8  ;;  %p505_p7 = scmp.lt.s32.totalorder %s499_s30, %s722_s2 }
  0x26   : > { %p501_p4 = scmp.ne.s32.totalorder %s499_s30, %s500_s3  ;;  %p506_p8 = scmp.lt.s32.totalorder %s504_s6, %s500_s3 }
  0x28   : > { %p502_p5 = pnand %p501_p4, %p636_p9  ;;  %p507_p10 = por %p506_p8, %p505_p7 }
  0x2a   : > { %v187_v4 = vld.sshfl [vmem:[#allocation1 + $0x8] sm:$0xff pattern:$0x75316420]  ;;  %v186_v6 = vld.sshfl [vmem:[#allocation1] sm:$0xff pattern:$0x75316420]  ;;  %p503_p6 = pneg %p502_p5 }
  0x2b   : > { %v198_v5 = vsel %vm190_vm0, %v187_v4, 0.0  ;;  %v191_v8 = vsel %vm190_vm0, %v186_v6, 0.0 }
  0x2c   : > { %v199_v7 = vrot.slane %v198_v5, 4  ;;  %v192_v9 = vrot.slane %v191_v8, 4  ;;  %p508_p13 = pnand %p507_p10, %p503_p6 }
  0x2e   : > { %v200_v10 = vadd.f32 %v199_v7, %v198_v5  ;;  %v193_v11 = vadd.f32 %v192_v9, %v191_v8 }
  0x30   : > { %v201_v12 = vrot.slane %v200_v10, 2  ;;  %v194_v13 = vrot.slane %v193_v11, 2 }
  0x32   : > { %v202_v14 = vadd.f32 %v201_v12, %v200_v10  ;;  %v195_v15 = vadd.f32 %v194_v13, %v193_v11 }
  0x34   : > { %v203_v16 = vrot.slane %v202_v14, 1  ;;  %v196_v17 = vrot.slane %v195_v15, 1 }
  0x36   : > { %v204_v18 = vadd.f32 %v203_v16, %v202_v14  ;;  %v197_v19 = vadd.f32 %v196_v17, %v195_v15 }
  0x38   : > { %448 = vrsqrt.f32 %v204_v18  ;;  %vm224_vm1 = vcmp.eq.f32.partialorder %v204_v18, inf  ;;  %v227_v33 = vand.u32 2147483648, %v204_v18  ;;  %vm226_vm2 = vcmp.eq.f32.partialorder %v204_v18, 0.0 }
  0x39   : > { %450 = vrsqrt.f32 %v197_v19  ;;  %vm212_vm3 = vcmp.eq.f32.partialorder %v197_v19, inf  ;;  %v215_v36 = vand.u32 2147483648, %v197_v19  ;;  %vm214_vm4 = vcmp.eq.f32.partialorder %v197_v19, 0.0 }
  0x3e   : > { %v449_v20 = vpop.eup %448 }
  0x3f   : > { %v218_v21 = vmul.f32 %v449_v20, %v204_v18  ;;  %v451_v22 = vpop.eup %450 }
  0x40   : > { %v206_v23 = vmul.f32 %v451_v22, %v197_v19 }
  0x41   : > { %v219_v24 = vmul.f32 %v449_v20, %v218_v21 }
  0x42   : > { %v207_v25 = vmul.f32 %v451_v22, %v206_v23 }
  0x43   : > { %v220_v26 = vmul.f32 0.5, %v219_v24 }
  0x44   : > { %v208_v27 = vmul.f32 0.5, %v207_v25 }
  0x45   : > { %v221_v28 = vsub.f32 1.5, %v220_v26 }
  0x46   : > { %v209_v29 = vsub.f32 1.5, %v208_v27 }
  0x47   : > { %v222_v30 = vmul.f32 %v449_v20, %v221_v28 }
  0x48   : > { %v210_v31 = vmul.f32 %v451_v22, %v209_v29 }
  0x49   : > { %v223_v32 = vmul.f32 %v222_v30, %v204_v18 }
  0x4a   : > { %v211_v34 = vmul.f32 %v210_v31, %v197_v19 }
  0x4b   : > { %v225_v35 = vsel %vm224_vm1, %v204_v18, %v223_v32 }
  0x4c   : > { %v228_v37 = vsel %vm226_vm2, %v227_v33, %v225_v35  ;;  %v213_v38 = vsel %vm212_vm3, %v197_v19, %v211_v34 }
  0x4d   : > { %v230_v39 = vadd.f32 1e-10, %v228_v37  ;;  %v216_v40 = vsel %vm214_vm4, %v215_v36, %v213_v38 }
  0x4e   : > { %v229_v41 = vadd.f32 1e-10, %v216_v40 }
  0x4f   : > { %v233_v42 = vrot.slane %v230_v39, 4 }
  0x51   : > { %v234_v43 = vsel %vm190_vm0, %v229_v41, %v233_v42 }
  0x52   : > { %452 = vrcp.f32 %v234_v43  ;;  %vm241_vm5 = vweird.f32 %v234_v43  ;;  %v247_v48 = vand.u32 2147483648, %v234_v43  ;;  %v245_v50 = vand.u32 2147483647, %v234_v43 }
  0x54   : > { %v248_v51 = vor.u32 1.1754944e-38, %v247_v48  ;;  %vm246_vm8 = vcmp.eq.f32.partialorder %v245_v50, 8.507059e+37 }
  0x58   : > { %v453_v44 = vpop.eup %452 }
  0x59   : > { %v237_v45 = vmul.f32 %v453_v44, %v234_v43  ;;  %vm242_vm6 = vweird.f32 %v453_v44 }
  0x5a   : > { %vm243_vm7 = vmor %vm241_vm5, %vm242_vm6 }
  0x5b   : > { %v238_v46 = vsub.f32 1.0, %v237_v45 }
  0x5d   : > { %v239_v47 = vmul.f32 %v453_v44, %v238_v46 }
  0x5f   : > { %v240_v49 = vadd.f32 %v453_v44, %v239_v47 }
  0x61   : > { %v244_v54 = vsel %vm243_vm7, %v453_v44, %v240_v49 }
  0x62   : > { %v249_v55 = vsel %vm246_vm8, %v248_v51, %v244_v54 }
  0x63   : > { %v250_v57 = vmul.f32 %v249_v55, %v672_v2 }
  0x94   : > { %v255_v58 = vpop.permute.xlu0 %254 }
  0x95   : > { %v259_v59 = vperm.slane %v255_v58, %v258_v56 }
  0x97   : > { %v261_v60 = vmul.f32 %v259_v59, %v250_v57 }
  0x99   : > { %262 = vst [vmem:[%s179_s27] sm:$0xff] %v261_v60 }
  0x9a   : > { %511 = shalt.err (!%p508_p13)
}
  0x9b   : > { %385 = dma.vmem_to_hbm [thread:$0]  (%p636_p9), %s280_s28, 128, %s282_s29, %s264_s12  }
  0x9c PF: > { %s293_s7 = sand.u32 1, %s546_s9   ;;  %p392_p0 = pnand %p369_p12, %p643_p11 }
  0x9d   : > { %s294_s16 = scalar_lea.sflag [#allocation4], %s293_s7 }
  0x9e   : > { %p393_p1 = pneg %p392_p0 }
  0xa0   : > { %541 = dma.done.wait (%p393_p1), %s294_s16, 128  }
  0xa1   : > { %543 = vsyncadd (%p393_p1), %s294_s16, 4294967168  ;;  %s18_s14 = sadd.s32 1, %s566_s14   ;;  %s727_s9 = smov %s550_s10 }
  0xa2   : > { %p15_p2 = scmp.ge.s32.totalorder %s18_s14, 4   ;;  %s728_s10 = smov %s554_s11 }
  0xa3   : > { %s729_s11 = smov %s641_s23  ;;  %s730_s12 = smov %s562_s13 }
  0xa4   : > { %s731_s13 = smov %s733_s17  ;;  %17 = sbr.rel (!%p15_p2) target bundleno = 6 (0x6), region = 73 }
  0xa9   :  { %300 = vsyncpa [#allocation3], 1 }
  0xaa   :  { %302 = vsyncpa [#allocation3 + $0x1], 1 }
  0xab   :  { %303 = vsyncpa [#allocation4], 1 }
  0xac   :  { %305 = vsyncpa [#allocation4 + $0x1], 1 }

</bundles_post_ra>
